<compile_context>
chip_gen: v7x
topology: tpu7x:2x2x1
jax: 0.10.0
libtpu: 0.0.40
codegen_flags: <defaults>
</compile_context>

<pallas_src>
from functools import partial

import jax
import jax.numpy as jnp
from jax.experimental import pallas as pl
from jax.experimental.pallas import tpu as pltpu


# ----------------------------------------------------------------------------
# Kernels
# ----------------------------------------------------------------------------

def _norm_kernel(x_ref, w_ref, b_ref,                 # inputs  (VMEM)
                 y_ref, center_ref, stdev_ref,        # outputs (VMEM)
                 *, eps, affine, start, count, subtract_last):
    """Per-row statistics + normalization for a (BB, T, C) block."""
    x = x_ref[...].astype(jnp.float32)                # (BB, T, C)

    # Statistics over the static time window [start, start+count)
    # (implements the norm_len_back / norm_len_front slicing of the module).
    xw = x[:, start:start + count, :]                 # (BB, count, C), static slice
    inv_cnt = 1.0 / float(count)
    mean = jnp.sum(xw, axis=1, keepdims=True) * inv_cnt            # (BB,1,C)
    diff = xw - mean
    var = jnp.sum(diff * diff, axis=1, keepdims=True) * inv_cnt    # unbiased=False

    # One EUP rsqrt on the (BB,1,C) stats; stdev = (var+eps)*rsqrt(var+eps).
    inv_std = jax.lax.rsqrt(var + eps)                             # (BB,1,C)
    stdev = (var + eps) * inv_std                                  # == sqrt(var+eps)

    if subtract_last:
        # Center on the last element of the stats window (matches module:
        # stdev is still the mean-based one — intentional, as in PyTorch).
        center = x[:, start + count - 1:start + count, :]          # (BB,1,C)
    else:
        center = mean

    # Fold affine into per-channel scale/offset: y = x*scale + offset.
    if affine:
        w = w_ref[...]                                             # (1,1,C)
        b = b_ref[...]
        scale = inv_std * w                                        # (BB,1,C)
        offset = b - center * scale
    else:
        scale = inv_std
        offset = -center * scale

    y_ref[...] = (x * scale + offset).astype(y_ref.dtype)
    center_ref[...] = center.astype(center_ref.dtype)
    stdev_ref[...] = stdev.astype(stdev_ref.dtype)


def _denorm_kernel(x_ref, center_ref, stdev_ref, w_ref, b_ref, y_ref,
                   *, eps, affine):
    """Denormalize a (BB, T, C) block: y = x*scale + offset, per-channel stats."""
    x = x_ref[...].astype(jnp.float32)                # (BB, T, C)
    stdev = stdev_ref[...]                            # (BB, 1, C)
    center = center_ref[...]                          # (BB, 1, C)

    if affine:
        w = w_ref[...]                                # (1, 1, C)
        b = b_ref[...]
        # NOTE: (w + eps*eps) matches the PyTorch RevIN quirk; it is NOT a
        # real guard against w ≈ 0 (would still produce inf/nan).
        recip_w = 1.0 / (w + eps * eps)               # per-channel, tiny
        scale = stdev * recip_w                       # (BB,1,C)
        offset = center - b * scale
    else:
        scale = stdev
        offset = center

    y_ref[...] = (x * scale + offset).astype(y_ref.dtype)


# ----------------------------------------------------------------------------
# Wrapper
# ----------------------------------------------------------------------------

def _pick_block_batch(B, T, C, target_bytes=2 << 20):
    """Largest divisor of B with BB*T*C*4B <= ~2 MiB (safe for v5e/v6e/v7x)."""
    row_bytes = max(T * C * 4, 1)
    bb = max(1, min(B, target_bytes // row_bytes))
    while B % bb != 0:
        bb -= 1
    return bb


class RevIN:
    """JAX/Pallas port of the PyTorch RevIN module.

    State (center = mean-or-last, and stdev) is stored on the Python object
    between 'norm' and 'denorm' calls, like the nn.Module buffers.
    """

    def __init__(self, num_features: int, eps=1e-5, affine=True, subtract_last=False):
        self.num_features = num_features
        self.eps = float(eps)
        self.affine = affine
        self.subtract_last = subtract_last
        # deterministic init (matches nn.Parameter(torch.ones/zeros))
        self.affine_weight = jnp.ones((num_features,), jnp.float32)
        self.affine_bias = jnp.zeros((num_features,), jnp.float32)
        self.center = None   # mean (or last element if subtract_last)
        self.stdev = None

    def __call__(self, x, mode: str, norm_len_back=None, norm_len_front=None):
        if mode == 'norm':
            return self._norm(x, norm_len_back, norm_len_front)
        elif mode == 'denorm':
            return self._denorm(x)
        else:
            raise NotImplementedError

    # ---- norm ------------------------------------------------------------
    def _norm(self, x, norm_len_back, norm_len_front):
        assert norm_len_back is None or norm_len_front is None
        B, T, C = x.shape
        assert C == self.num_features

        if norm_len_back is not None:
            start, count = T - int(norm_len_back), int(norm_len_back)
        elif norm_len_front is not None:
            start, count = 0, int(norm_len_front)
        else:
            start, count = 0, T
        assert count >= 1 and 0 <= start and start + count <= T

        w = self.affine_weight.reshape(1, 1, C).astype(jnp.float32)
        b = self.affine_bias.reshape(1, 1, C).astype(jnp.float32)

        bb = _pick_block_batch(B, T, C)
        kernel = partial(_norm_kernel, eps=self.eps, affine=self.affine,
                         start=start, count=count,
                         subtract_last=self.subtract_last)

        y, center, stdev = pl.pallas_call(
            kernel,
            out_shape=(jax.ShapeDtypeStruct((B, T, C), x.dtype),
                       jax.ShapeDtypeStruct((B, 1, C), jnp.float32),
                       jax.ShapeDtypeStruct((B, 1, C), jnp.float32)),
            grid_spec=pltpu.PrefetchScalarGridSpec(
                num_scalar_prefetch=0,
                grid=(B // bb,),
                in_specs=[
                    pl.BlockSpec((bb, T, C), lambda i: (i, 0, 0)),
                    pl.BlockSpec((1, 1, C), lambda i: (0, 0, 0)),
                    pl.BlockSpec((1, 1, C), lambda i: (0, 0, 0)),
                ],
                out_specs=(
                    pl.BlockSpec((bb, T, C), lambda i: (i, 0, 0)),
                    pl.BlockSpec((bb, 1, C), lambda i: (i, 0, 0)),
                    pl.BlockSpec((bb, 1, C), lambda i: (i, 0, 0)),
                ),
            ),
            compiler_params=pltpu.CompilerParams(
                dimension_semantics=("parallel",)),
        )(x, w, b)

        self.center = center
        self.stdev = stdev
        return y

    # ---- denorm ----------------------------------------------------------
    def _denorm(self, x):
        assert self.center is not None and self.stdev is not None
        B, T, C = x.shape
        assert C == self.num_features

        w = self.affine_weight.reshape(1, 1, C).astype(jnp.float32)
        b = self.affine_bias.reshape(1, 1, C).astype(jnp.float32)

        bb = _pick_block_batch(B, T, C)
        kernel = partial(_denorm_kernel, eps=self.eps, affine=self.affine)

        y = pl.pallas_call(
            kernel,
            out_shape=jax.ShapeDtypeStruct((B, T, C), x.dtype),
            grid_spec=pltpu.PrefetchScalarGridSpec(
                num_scalar_prefetch=0,
                grid=(B // bb,),
                in_specs=[
                    pl.BlockSpec((bb, T, C), lambda i: (i, 0, 0)),
                    pl.BlockSpec((bb, 1, C), lambda i: (i, 0, 0)),
                    pl.BlockSpec((bb, 1, C), lambda i: (i, 0, 0)),
                    pl.BlockSpec((1, 1, C), lambda i: (0, 0, 0)),
                    pl.BlockSpec((1, 1, C), lambda i: (0, 0, 0)),
                ],
                out_specs=pl.BlockSpec((bb, T, C), lambda i: (i, 0, 0)),
            ),
            compiler_params=pltpu.CompilerParams(
                dimension_semantics=("parallel",)),
        )(x, self.center, self.stdev, w, b)
        return y


# ----------------------------------------------------------------------------
# Self-test
# ----------------------------------------------------------------------------

if __name__ == "__main__":
    key = jax.random.PRNGKey(0)
    B, T, C = 4, 16, 128          # C = 128 → lane-dense stores
    k1, k2, k3 = jax.random.split(key, 3)
    x = jax.random.normal(k1, (B, T, C), jnp.float32) * 2.0 + 1.5

    revin = RevIN(num_features=C, eps=1e-5, affine=True, subtract_last=False)
    # Non-trivial but deterministic affine parameters to exercise the path.
    revin.affine_weight = jax.random.uniform(k2, (C,), jnp.float32, 0.5, 1.5)
    revin.affine_bias = jax.random.uniform(k3, (C,), jnp.float32, -0.5, 0.5)

    # --- norm over full sequence, then denorm (round trip) ---
    y = revin(x, 'norm')
    jax.block_until_ready(y)
    x_rec = revin(y, 'denorm')
    jax.block_until_ready(x_rec)

    mean = jnp.mean(x, axis=1, keepdims=True)
    stdev = jnp.sqrt(jnp.var(x, axis=1, keepdims=True) + 1e-5)
    y_ref = (x - mean) / stdev * revin.affine_weight + revin.affine_bias
    assert jnp.allclose(y, y_ref, atol=1e-4, rtol=1e-4)
    x_rec_ref = ((y_ref - revin.affine_bias) /
                 (revin.affine_weight + 1e-5 ** 2)) * stdev + mean
    assert jnp.allclose(x_rec, x_rec_ref, atol=1e-4, rtol=1e-4)

    # --- norm_len_back path (stats from last 4 timesteps only) ---
    y2 = revin(x, 'norm', norm_len_back=4)
    jax.block_until_ready(y2)
    xs = x[:, -4:, :]
    mean2 = jnp.mean(xs, axis=1, keepdims=True)
    stdev2 = jnp.sqrt(jnp.var(xs, axis=1, keepdims=True) + 1e-5)
    y2_ref = (x - mean2) / stdev2 * revin.affine_weight + revin.affine_bias
    assert jnp.allclose(y2, y2_ref, atol=1e-4, rtol=1e-4)

    # --- subtract_last variant ---
    revin_sl = RevIN(num_features=C, eps=1e-5, affine=True, subtract_last=True)
    revin_sl.affine_weight = revin.affine_weight
    revin_sl.affine_bias = revin.affine_bias
    y3 = revin_sl(x, 'norm')
    jax.block_until_ready(y3)
    last = x[:, -1:, :]
    y3_ref = (x - last) / stdev * revin.affine_weight + revin.affine_bias
    assert jnp.allclose(y3, y3_ref, atol=1e-4, rtol=1e-4)

    # --- affine=False round trip ---
    revin_na = RevIN(num_features=C, eps=1e-5, affine=False, subtract_last=False)
    y4 = revin_na(x, 'norm')
    jax.block_until_ready(y4)
    assert jnp.allclose(y4, (x - mean) / stdev, atol=1e-4, rtol=1e-4)
    x4 = revin_na(y4, 'denorm')
    jax.block_until_ready(x4)
    assert jnp.allclose(x4, x, atol=1e-4, rtol=1e-4)

    print("KERNEL_OK")
</pallas_src>

<mosaic_0001>
module attributes {stable_mosaic.version = 11 : i64} {
  func.func @_norm_kernel(%arg0: i32, %arg1: memref<4x16x128xf32, #tpu.memory_space<vmem>>, %arg2: memref<1x1x128xf32, #tpu.memory_space<vmem>>, %arg3: memref<1x1x128xf32, #tpu.memory_space<vmem>>, %arg4: memref<4x16x128xf32, #tpu.memory_space<vmem>>, %arg5: memref<4x1x128xf32, #tpu.memory_space<vmem>>, %arg6: memref<4x1x128xf32, #tpu.memory_space<vmem>>) attributes {dimension_semantics = [#tpu.dimension_semantics<parallel>], iteration_bounds = array<i64: 1>, scalar_prefetch = 0 : i64, scratch_operands = 0 : i64, tpu.core_type = #tpu.core_type<tc>, window_params = [{transform_indices = @transform_0, window_bounds = array<i64: 4, 16, 128>}, {pipeline_mode = #tpu.pipeline_mode<synchronous>, transform_indices = @transform_1, window_bounds = array<i64: 1, 1, 128>}, {pipeline_mode = #tpu.pipeline_mode<synchronous>, transform_indices = @transform_2, window_bounds = array<i64: 1, 1, 128>}, {transform_indices = @transform_3, window_bounds = array<i64: 4, 16, 128>}, {transform_indices = @transform_4, window_bounds = array<i64: 4, 1, 128>}, {transform_indices = @transform_5, window_bounds = array<i64: 4, 1, 128>}]} {
    %c0 = arith.constant 0 : index
    %c0_0 = arith.constant 0 : index
    %c0_1 = arith.constant 0 : index
    %0 = vector.load %arg1[%c0, %c0_0, %c0_1] : memref<4x16x128xf32, #tpu.memory_space<vmem>>, vector<4x16x128xf32>
    %cst = arith.constant dense<0.000000e+00> : vector<4x128xf32>
    %1 = vector.multi_reduction <add>, %0, %cst [1] : vector<4x16x128xf32> to vector<4x128xf32>
    %2 = vector.shape_cast %1 : vector<4x128xf32> to vector<4x1x128xf32>
    %cst_2 = arith.constant 6.250000e-02 : f32
    %3 = vector.broadcast %cst_2 : f32 to vector<4x1x128xf32>
    %4 = arith.mulf %2, %3 : vector<4x1x128xf32>
    %5 = vector.broadcast %4 : vector<4x1x128xf32> to vector<4x16x128xf32>
    %6 = arith.subf %0, %5 : vector<4x16x128xf32>
    %7 = arith.mulf %6, %6 : vector<4x16x128xf32>
    %cst_3 = arith.constant dense<0.000000e+00> : vector<4x128xf32>
    %8 = vector.multi_reduction <add>, %7, %cst_3 [1] : vector<4x16x128xf32> to vector<4x128xf32>
    %9 = vector.shape_cast %8 : vector<4x128xf32> to vector<4x1x128xf32>
    %cst_4 = arith.constant 6.250000e-02 : f32
    %10 = vector.broadcast %cst_4 : f32 to vector<4x1x128xf32>
    %11 = arith.mulf %9, %10 : vector<4x1x128xf32>
    %cst_5 = arith.constant 9.99999974E-6 : f32
    %12 = vector.broadcast %cst_5 : f32 to vector<4x1x128xf32>
    %13 = arith.addf %11, %12 : vector<4x1x128xf32>
    %14 = math.rsqrt %13 : vector<4x1x128xf32>
    %cst_6 = arith.constant 9.99999974E-6 : f32
    %15 = vector.broadcast %cst_6 : f32 to vector<4x1x128xf32>
    %16 = arith.addf %11, %15 : vector<4x1x128xf32>
    %17 = arith.mulf %16, %14 : vector<4x1x128xf32>
    %c0_7 = arith.constant 0 : index
    %c0_8 = arith.constant 0 : index
    %c0_9 = arith.constant 0 : index
    %18 = vector.load %arg2[%c0_7, %c0_8, %c0_9] : memref<1x1x128xf32, #tpu.memory_space<vmem>>, vector<1x1x128xf32>
    %c0_10 = arith.constant 0 : index
    %c0_11 = arith.constant 0 : index
    %c0_12 = arith.constant 0 : index
    %19 = vector.load %arg3[%c0_10, %c0_11, %c0_12] : memref<1x1x128xf32, #tpu.memory_space<vmem>>, vector<1x1x128xf32>
    %20 = vector.broadcast %18 : vector<1x1x128xf32> to vector<4x1x128xf32>
    %21 = arith.mulf %14, %20 : vector<4x1x128xf32>
    %22 = arith.mulf %4, %21 : vector<4x1x128xf32>
    %23 = vector.broadcast %19 : vector<1x1x128xf32> to vector<4x1x128xf32>
    %24 = arith.subf %23, %22 : vector<4x1x128xf32>
    %25 = vector.broadcast %21 : vector<4x1x128xf32> to vector<4x16x128xf32>
    %26 = arith.mulf %0, %25 : vector<4x16x128xf32>
    %27 = vector.broadcast %24 : vector<4x1x128xf32> to vector<4x16x128xf32>
    %28 = arith.addf %26, %27 : vector<4x16x128xf32>
    %c0_13 = arith.constant 0 : index
    %c0_14 = arith.constant 0 : index
    %c0_15 = arith.constant 0 : index
    %29 = vector.load %arg4[%c0_13, %c0_14, %c0_15] : memref<4x16x128xf32, #tpu.memory_space<vmem>>, vector<4x16x128xf32>
    tpu.vector_store %arg4[%c0_13, %c0_14, %c0_15], %28 {strides = array<i32>} : memref<4x16x128xf32, #tpu.memory_space<vmem>>, vector<4x16x128xf32>,
    %c0_16 = arith.constant 0 : index
    %c0_17 = arith.constant 0 : index
    %c0_18 = arith.constant 0 : index
    %30 = vector.load %arg5[%c0_16, %c0_17, %c0_18] : memref<4x1x128xf32, #tpu.memory_space<vmem>>, vector<4x1x128xf32>
    tpu.vector_store %arg5[%c0_16, %c0_17, %c0_18], %4 {strides = array<i32>} : memref<4x1x128xf32, #tpu.memory_space<vmem>>, vector<4x1x128xf32>,
    %c0_19 = arith.constant 0 : index
    %c0_20 = arith.constant 0 : index
    %c0_21 = arith.constant 0 : index
    %31 = vector.load %arg6[%c0_19, %c0_20, %c0_21] : memref<4x1x128xf32, #tpu.memory_space<vmem>>, vector<4x1x128xf32>
    tpu.vector_store %arg6[%c0_19, %c0_20, %c0_21], %17 {strides = array<i32>} : memref<4x1x128xf32, #tpu.memory_space<vmem>>, vector<4x1x128xf32>,
    return
  }
  func.func @transform_0(%arg0: i32) -> (i32, i32, i32) {
    %c0_i32 = arith.constant 0 : i32
    %c0_i32_0 = arith.constant 0 : i32
    %c0_i32_1 = arith.constant 0 : i32
    return %arg0, %c0_i32, %c0_i32_0 : i32, i32, i32
  }
  func.func @transform_1(%arg0: i32) -> (i32, i32, i32) {
    %c0_i32 = arith.constant 0 : i32
    %c0_i32_0 = arith.constant 0 : i32
    %c0_i32_1 = arith.constant 0 : i32
    %c0_i32_2 = arith.constant 0 : i32
    return %c0_i32, %c0_i32_0, %c0_i32_1 : i32, i32, i32
  }
  func.func @transform_2(%arg0: i32) -> (i32, i32, i32) {
    %c0_i32 = arith.constant 0 : i32
    %c0_i32_0 = arith.constant 0 : i32
    %c0_i32_1 = arith.constant 0 : i32
    %c0_i32_2 = arith.constant 0 : i32
    return %c0_i32, %c0_i32_0, %c0_i32_1 : i32, i32, i32
  }
  func.func @transform_3(%arg0: i32) -> (i32, i32, i32) {
    %c0_i32 = arith.constant 0 : i32
    %c0_i32_0 = arith.constant 0 : i32
    %c0_i32_1 = arith.constant 0 : i32
    return %arg0, %c0_i32, %c0_i32_0 : i32, i32, i32
  }
  func.func @transform_4(%arg0: i32) -> (i32, i32, i32) {
    %c0_i32 = arith.constant 0 : i32
    %c0_i32_0 = arith.constant 0 : i32
    %c0_i32_1 = arith.constant 0 : i32
    return %arg0, %c0_i32, %c0_i32_0 : i32, i32, i32
  }
  func.func @transform_5(%arg0: i32) -> (i32, i32, i32) {
    %c0_i32 = arith.constant 0 : i32
    %c0_i32_0 = arith.constant 0 : i32
    %c0_i32_1 = arith.constant 0 : i32
    return %arg0, %c0_i32, %c0_i32_0 : i32, i32, i32
  }
}

</mosaic_0001>

<bundles_post_ra>
// kernel: tpu_custom_call.1
= control target key start
LH: loop header
LB: loop body
LE: loop exit
PB: predicated region body
PF: predicated region fallthrough
CT: control target
= control target key end

     0   :  { %11 = vsyncpa [#allocation3], 0  ;;  %s569_s0 = inlined_call_operand.hbm [shape: f32[4,16,128], index: 0, kind: input, shape index: {}]   ;;  %s570_s1 = inlined_call_operand.vmem [shape: f32[1,1,128], index: 1, kind: input, shape index: {}]   ;;  %s571_s2 = inlined_call_operand.vmem [shape: f32[1,1,128], index: 2, kind: input, shape index: {}]   ;;  %s572_s3 = inlined_call_operand.hbm [shape: f32[4,16,128], index: 3, kind: output, shape index: {0}]   ;;  %s573_s4 = inlined_call_operand.hbm [shape: f32[4,1,128], index: 4, kind: output, shape index: {1}]   ;;  %s574_s5 = inlined_call_operand.hbm [shape: f32[4,1,128], index: 5, kind: output, shape index: {2}]  }
   0x1   :  { %12 = vsyncpa [#allocation4], 0 }
   0x2   :  { %13 = vsyncpa [#allocation7], 0  ;;  %s377_s18 = smov [#allocation2]   ;;  %s283_s22 = scalar_lea.hbm %s569_s0, 1024 }
   0x3   :  { %s19_s19 = sshll.u32 %s377_s18, 4  ;;  %p284_p0 = scmp.ne.s32.totalorder %s569_s0, %s283_s22  ;;  %s20_s19 = int_to_ptr.vmem [resolvable:$true] %s19_s19 }
   0x4   :  { %p287_p1 = scmp.lt.u32.totalorder %s283_s22, %s569_s0 }
   0x6   :  { %p289_p2 = pnand %p287_p1, %p284_p0 }
   0x8   :  { %292 = shalt.err (!%p289_p2)
}
   0x9   :  { %s293_s27 = scalar_lea.vmem %s20_s19, 1024  ;;  %p298_p4 = scmp.lt.s32.totalorder %s20_s19, %s20_s19 }
   0xa   :  { %p294_p3 = scmp.ne.s32.totalorder %s20_s19, %s293_s27  ;;  %p299_p5 = scmp.lt.s32.totalorder %s293_s27, %s293_s27 }
   0xc   :  { %p300_p6 = por %p299_p5, %p298_p4 }
   0xe   :  { %p301_p7 = pnand %p300_p6, %p294_p3 }
  0x10   :  { %304 = shalt.err (!%p301_p7)
}
  0x11   :  { %s378_s28 = smov 128   ;;  %s379_s29 = smov 8  }
  0x12   :  { %25 = dma.hbm_to_vmem [thread:$0]  %s569_s0, 1024, %s20_s19, [#allocation3], %s378_s28, %s378_s28, %s379_s29  }
  0x13   :  { %371 = dma.done.wait [#allocation3], 1024  }
  0x14   :  { %372 = vsyncadd [#allocation3], 4294966272  ;;  %v430_v0 = vld [vmem:[#allocation2] sm:$0xff]  ;;  %v432_v1 = vld [vmem:[#allocation2 + $0x8] sm:$0xff]  ;;  %s380_s0 = smov [#allocation6]  }
  0x15   :  { %v434_v2 = vld [vmem:[#allocation2 + $0x10] sm:$0xff]  ;;  %v41_v3 = vadd.f32 %v432_v1, %v430_v0  ;;  %v438_v4 = vld [vmem:[#allocation2 + $0x18] sm:$0xff]  ;;  %v440_v5 = vld [vmem:[#allocation2 + $0x20] sm:$0xff]  ;;  %s236_s7 = sshll.u32 %s380_s0, 4  ;;  %s467_s7 = int_to_ptr.vmem [resolvable:$true] %s236_s7 }
  0x16   :  { %v442_v6 = vld [vmem:[#allocation2 + $0x28] sm:$0xff]  ;;  %v48_v7 = vadd.f32 %v438_v4, %v434_v2  ;;  %v448_v9 = vld [vmem:[#allocation2 + $0x30] sm:$0xff]  ;;  %v450_v10 = vld [vmem:[#allocation2 + $0x38] sm:$0xff]  ;;  %s305_s8 = scalar_lea.vmem %s467_s7, 64  ;;  %p310_p9 = scmp.lt.s32.totalorder %s467_s7, %s467_s7 }
  0x17   :  { %v55_v8 = vadd.f32 %v442_v6, %v440_v5  ;;  %v42_v11 = vrot.slane %v41_v3, 4  ;;  %v62_v12 = vadd.f32 %v450_v10, %v448_v9  ;;  %p306_p8 = scmp.ne.s32.totalorder %s467_s7, %s305_s8  ;;  %p311_p10 = scmp.lt.s32.totalorder %s305_s8, %s305_s8 }
  0x18   :  { %v49_v13 = vrot.slane %v48_v7, 4 }
  0x19   :  { %v56_v14 = vrot.slane %v55_v8, 4  ;;  %v43_v15 = vadd.f32 %v42_v11, %v41_v3  ;;  %v63_v16 = vrot.slane %v62_v12, 4  ;;  %p312_p11 = por %p311_p10, %p310_p9 }
  0x1a   :  { %v50_v17 = vadd.f32 %v49_v13, %v48_v7 }
  0x1b   :  { %v57_v18 = vadd.f32 %v56_v14, %v55_v8  ;;  %v44_v19 = vrot.slane %v43_v15, 2  ;;  %v64_v20 = vadd.f32 %v63_v16, %v62_v12  ;;  %p313_p12 = pnand %p312_p11, %p306_p8 }
  0x1c   :  { %v51_v21 = vrot.slane %v50_v17, 2 }
  0x1d   :  { %v58_v22 = vrot.slane %v57_v18, 2  ;;  %v45_v23 = vadd.f32 %v44_v19, %v43_v15  ;;  %v65_v24 = vrot.slane %v64_v20, 2 }
  0x1e   :  { %v52_v25 = vadd.f32 %v51_v21, %v50_v17 }
  0x1f   :  { %v59_v26 = vadd.f32 %v58_v22, %v57_v18  ;;  %v46_v27 = vrot.slane %v45_v23, 1  ;;  %v66_v28 = vadd.f32 %v65_v24, %v64_v20 }
  0x20   :  { %v53_v29 = vrot.slane %v52_v25, 1 }
  0x21   :  { %v60_v30 = vrot.slane %v59_v26, 1  ;;  %v47_v31 = vadd.f32 %v46_v27, %v45_v23  ;;  %v67_v32 = vrot.slane %v66_v28, 1 }
  0x22   :  { %v54_v33 = vadd.f32 %v53_v29, %v52_v25 }
  0x23   :  { %v61_v34 = vadd.f32 %v60_v30, %v59_v26  ;;  %v454_v35 = vmul.f32 0.0625, %v47_v31  ;;  %v68_v36 = vadd.f32 %v67_v32, %v66_v28 }
  0x24   :  { %v456_v37 = vmul.f32 0.0625, %v54_v33 }
  0x25   :  { %v458_v38 = vmul.f32 0.0625, %v61_v34  ;;  %v73_v39 = vsub.f32 %v430_v0, %v454_v35  ;;  %v74_v40 = vsub.f32 %v432_v1, %v454_v35  ;;  %211 = vst [vmem:[#allocation6] sm:$0x1] %v454_v35  ;;  %v465_v41 = vmul.f32 0.0625, %v68_v36 }
  0x26   :  { %v75_v42 = vsub.f32 %v434_v2, %v456_v37  ;;  %v76_v43 = vsub.f32 %v438_v4, %v456_v37  ;;  %212 = vst [vmem:[#allocation6 + $0x1] sm:$0x1] %v456_v37 }
  0x27   :  { %v77_v44 = vsub.f32 %v440_v5, %v458_v38  ;;  %v78_v45 = vsub.f32 %v442_v6, %v458_v38  ;;  %213 = vst [vmem:[#allocation6 + $0x2] sm:$0x1] %v458_v38  ;;  %v81_v46 = vmul.f32 %v73_v39, %v73_v39  ;;  %v82_v47 = vmul.f32 %v74_v40, %v74_v40 }
  0x28   :  { %v79_v48 = vsub.f32 %v448_v9, %v465_v41  ;;  %v80_v49 = vsub.f32 %v450_v10, %v465_v41  ;;  %214 = vst [vmem:[#allocation6 + $0x3] sm:$0x1] %v465_v41  ;;  %v83_v50 = vmul.f32 %v75_v42, %v75_v42  ;;  %v84_v51 = vmul.f32 %v76_v43, %v76_v43 }
  0x29   :  { %v85_v52 = vmul.f32 %v77_v44, %v77_v44  ;;  %v86_v53 = vmul.f32 %v78_v45, %v78_v45 }
  0x2a   :  { %316 = shalt.err (!%p313_p12)
}
  0x2b   :  { %s317_s11 = scalar_lea.hbm %s573_s4, 64 }
  0x2c   :  { %p318_p13 = scmp.ne.s32.totalorder %s573_s4, %s317_s11  ;;  %p321_p0 = scmp.lt.u32.totalorder %s317_s11, %s573_s4 }
  0x2e   :  { %p323_p1 = pnand %p321_p0, %p318_p13 }
  0x30   :  { %326 = shalt.err (!%p323_p1)
}
  0x31   :  { %s381_s16 = smov 16   ;;  %s382_s17 = smov 1   ;;  %v89_v54 = vadd.f32 %v82_v47, %v81_v46  ;;  %v87_v55 = vmul.f32 %v79_v48, %v79_v48  ;;  %v88_v56 = vmul.f32 %v80_v49, %v80_v49  ;;  %v96_v57 = vadd.f32 %v84_v51, %v83_v50  ;;  %v133_v42 = vld [vmem:[%s570_s1] sm:$0x1] }
  0x32   :  { %242 = dma.vmem_to_hbm [thread:$0]  %s467_s7, 64, %s573_s4, [#allocation7], %s381_s16, %s381_s16, %s382_s17   ;;  %v103_v58 = vadd.f32 %v86_v53, %v85_v52  ;;  %v147_v39 = vlaneseq }
  0x33   :  { %v90_v59 = vrot.slane %v89_v54, 4  ;;  %v110_v60 = vadd.f32 %v88_v56, %v87_v55  ;;  %v97_v61 = vrot.slane %v96_v57, 4  ;;  %s383_s21 = smov [#allocation8]   ;;  %v134_v49 = vld [vmem:[%s571_s2] sm:$0x1] }
  0x34   :  { %v104_v62 = vrot.slane %v103_v58, 4  ;;  %v148_v40 = vshrl.u32 %v147_v39, 7  ;;  %s248_s22 = sshll.u32 %s383_s21, 4  ;;  %s516_s22 = int_to_ptr.vmem [resolvable:$true] %s248_s22 }
  0x35   :  { %v91_v63 = vadd.f32 %v90_v59, %v89_v54  ;;  %v111_v3 = vrot.slane %v110_v60, 4  ;;  %v98_v7 = vadd.f32 %v97_v61, %v96_v57  ;;  %s327_s1 = scalar_lea.vmem %s516_s22, 64  ;;  %p332_p3 = scmp.lt.s32.totalorder %s516_s22, %s516_s22 }
  0x36   :  { %v105_v8 = vadd.f32 %v104_v62, %v103_v58  ;;  %v507_v43 = vsub.s32 0, %v148_v40  ;;  %p328_p2 = scmp.ne.s32.totalorder %s516_s22, %s327_s1  ;;  %p333_p4 = scmp.lt.s32.totalorder %s327_s1, %s327_s1 }
  0x37   :  { %v92_v11 = vrot.slane %v91_v63, 2  ;;  %v112_v12 = vadd.f32 %v111_v3, %v110_v60  ;;  %v99_v13 = vrot.slane %v98_v7, 2 }
  0x38   :  { %v106_v14 = vrot.slane %v105_v8, 2  ;;  %p334_p5 = por %p333_p4, %p332_p3 }
  0x39   :  { %v93_v15 = vadd.f32 %v92_v11, %v91_v63  ;;  %v113_v16 = vrot.slane %v112_v12, 2  ;;  %v100_v17 = vadd.f32 %v99_v13, %v98_v7 }
  0x3a   :  { %v107_v18 = vadd.f32 %v106_v14, %v105_v8  ;;  %p335_p6 = pnand %p334_p5, %p328_p2 }
  0x3b   :  { %v114_v19 = vadd.f32 %v113_v16, %v112_v12  ;;  %v94_v20 = vrot.slane %v93_v15, 1  ;;  %v101_v21 = vrot.slane %v100_v17, 1 }
  0x3c   :  { %v108_v22 = vrot.slane %v107_v18, 1 }
  0x3d   :  { %v95_v23 = vadd.f32 %v94_v20, %v93_v15  ;;  %v115_v24 = vrot.slane %v114_v19, 1  ;;  %v102_v25 = vadd.f32 %v101_v21, %v100_v17 }
  0x3e   :  { %v109_v26 = vadd.f32 %v108_v22, %v107_v18 }
  0x3f   :  { %v117_v27 = vmul.f32 0.0625, %v95_v23  ;;  %v116_v28 = vadd.f32 %v115_v24, %v114_v19  ;;  %v118_v29 = vmul.f32 0.0625, %v102_v25 }
  0x40   :  { %v119_v30 = vmul.f32 0.0625, %v109_v26 }
  0x41   :  { %v121_v31 = vadd.f32 1e-05, %v117_v27  ;;  %v120_v32 = vmul.f32 0.0625, %v116_v28  ;;  %v122_v33 = vadd.f32 1e-05, %v118_v29 }
  0x42   :  { %v123_v34 = vadd.f32 1e-05, %v119_v30 }
  0x43   :  { %275 = vrsqrt.f32 %v121_v31  ;;  %v124_v36 = vadd.f32 1e-05, %v120_v32 }
  0x44   :  { %277 = vrsqrt.f32 %v122_v33 }
  0x45   :  { %279 = vrsqrt.f32 %v123_v34 }
  0x46   :  { %281 = vrsqrt.f32 %v124_v36 }
  0x4d   :  { %v276_v44 = vpop.eup %275 }
  0x4e   :  { %v278_v45 = vpop.eup %277  ;;  %v135_v46 = vmul.f32 %v276_v44, %v133_v42  ;;  %v129_v47 = vmul.f32 %v276_v44, %v121_v31 }
  0x4f   :  { %v280_v48 = vpop.eup %279  ;;  %v136_v50 = vmul.f32 %v278_v45, %v133_v42  ;;  %v130_v51 = vmul.f32 %v278_v45, %v122_v33 }
  0x50   :  { %v282_v52 = vpop.eup %281  ;;  %v139_v53 = vmul.f32 %v135_v46, %v454_v35  ;;  %v150_v54 = vrot.slane %v135_v46, %v507_v43  ;;  %v137_v55 = vmul.f32 %v280_v48, %v133_v42  ;;  %215 = vst [vmem:[#allocation8] sm:$0x1] %v129_v47  ;;  %v131_v56 = vmul.f32 %v280_v48, %v123_v34 }
  0x51   :  { %v140_v57 = vmul.f32 %v136_v50, %v456_v37  ;;  %v154_v58 = vrot.slane %v136_v50, %v507_v43  ;;  %v138_v59 = vmul.f32 %v282_v52, %v133_v42  ;;  %216 = vst [vmem:[#allocation8 + $0x1] sm:$0x1] %v130_v51  ;;  %v132_v60 = vmul.f32 %v282_v52, %v124_v36 }
  0x52   :  { %v143_v61 = vsub.f32 %v134_v49, %v139_v53  ;;  %v163_v35 = vmul.f32 %v150_v54, %v430_v0  ;;  %v164_v62 = vmul.f32 %v150_v54, %v432_v1  ;;  %v141_v63 = vmul.f32 %v137_v55, %v458_v38  ;;  %217 = vst [vmem:[#allocation8 + $0x2] sm:$0x1] %v131_v56 }
  0x53   :  { %v144_v3 = vsub.f32 %v134_v49, %v140_v57  ;;  %v165_v37 = vmul.f32 %v154_v58, %v434_v2  ;;  %v166_v7 = vmul.f32 %v154_v58, %v438_v4  ;;  %v158_v8 = vrot.slane %v137_v55, %v507_v43  ;;  %218 = vst [vmem:[#allocation8 + $0x3] sm:$0x1] %v132_v60 }
  0x54   :  { %v178_v11 = vrot.slane %v143_v61, %v507_v43  ;;  %v145_v12 = vsub.f32 %v134_v49, %v141_v63  ;;  %v142_v13 = vmul.f32 %v138_v59, %v465_v41  ;;  %v162_v0 = vrot.slane %v138_v59, %v507_v43 }
  0x55   :  { %338 = shalt.err (!%p335_p6)
}
  0x56   :  { %s339_s26 = scalar_lea.hbm %s574_s5, 64 }
  0x57   :  { %p340_p7 = scmp.ne.s32.totalorder %s574_s5, %s339_s26  ;;  %p343_p8 = scmp.lt.u32.totalorder %s339_s26, %s574_s5 }
  0x59   :  { %p345_p9 = pnand %p343_p8, %p340_p7 }
  0x5b   :  { %348 = shalt.err (!%p345_p9)
}
  0x5c   :  { %254 = dma.vmem_to_hbm [thread:$0]  %s516_s22, 64, %s574_s5, [#allocation7], %s381_s16, %s381_s16, %s382_s17   ;;  %v182_v1 = vrot.slane %v144_v3, %v507_v43  ;;  %v167_v2 = vmul.f32 %v158_v8, %v440_v5  ;;  %v168_v4 = vmul.f32 %v158_v8, %v442_v6  ;;  %v195_v38 = vadd.f32 %v178_v11, %v163_v35 }
  0x5d   :  { %v196_v41 = vadd.f32 %v178_v11, %v164_v62  ;;  %v186_v14 = vrot.slane %v145_v12, %v507_v43  ;;  %v146_v15 = vsub.f32 %v134_v49, %v142_v13  ;;  %v169_v18 = vmul.f32 %v162_v0, %v448_v9  ;;  %s384_s9 = smov [#allocation5]  }
  0x5e   :  { %v197_v16 = vadd.f32 %v182_v1, %v165_v37  ;;  %v198_v17 = vadd.f32 %v182_v1, %v166_v7  ;;  %v170_v19 = vmul.f32 %v162_v0, %v450_v10  ;;  %s224_s10 = sshll.u32 %s384_s9, 4  ;;  %203 = vst [vmem:[#allocation5] sm:$0xff] %v195_v38  ;;  %s225_s10 = int_to_ptr.vmem [resolvable:$true] %s224_s10 }
  0x5f   :  { %204 = vst [vmem:[#allocation5 + $0x8] sm:$0xff] %v196_v41  ;;  %v199_v20 = vadd.f32 %v186_v14, %v167_v2  ;;  %v200_v21 = vadd.f32 %v186_v14, %v168_v4  ;;  %v190_v5 = vrot.slane %v146_v15, %v507_v43  ;;  %s349_s5 = scalar_lea.vmem %s225_s10, 1024  ;;  %p354_p11 = scmp.lt.s32.totalorder %s225_s10, %s225_s10 }
  0x60   :  { %205 = vst [vmem:[#allocation5 + $0x10] sm:$0xff] %v197_v16  ;;  %206 = vst [vmem:[#allocation5 + $0x18] sm:$0xff] %v198_v17  ;;  %p350_p10 = scmp.ne.s32.totalorder %s225_s10, %s349_s5  ;;  %p355_p12 = scmp.lt.s32.totalorder %s349_s5, %s349_s5 }
  0x61   :  { %207 = vst [vmem:[#allocation5 + $0x20] sm:$0xff] %v199_v20  ;;  %208 = vst [vmem:[#allocation5 + $0x28] sm:$0xff] %v200_v21  ;;  %v201_v6 = vadd.f32 %v190_v5, %v169_v18  ;;  %v202_v22 = vadd.f32 %v190_v5, %v170_v19 }
  0x62   :  { %p356_p13 = por %p355_p12, %p354_p11 }
  0x63   :  { %209 = vst [vmem:[#allocation5 + $0x30] sm:$0xff] %v201_v6  ;;  %210 = vst [vmem:[#allocation5 + $0x38] sm:$0xff] %v202_v22 }
  0x64   :  { %p357_p0 = pnand %p356_p13, %p350_p10 }
  0x66   :  { %360 = shalt.err (!%p357_p0)
}
  0x67   :  { %s361_s13 = scalar_lea.hbm %s572_s3, 1024 }
  0x68   :  { %p362_p1 = scmp.ne.s32.totalorder %s572_s3, %s361_s13  ;;  %p365_p2 = scmp.lt.u32.totalorder %s361_s13, %s572_s3 }
  0x6a   :  { %p367_p3 = pnand %p365_p2, %p362_p1 }
  0x6c   :  { %370 = shalt.err (!%p367_p3)
}
  0x6d   :  { %230 = dma.vmem_to_hbm [thread:$0]  %s225_s10, 1024, %s572_s3, [#allocation4], %s378_s28, %s378_s28, %s379_s29  }
  0x6e   :  { %373 = dma.done.wait [#allocation4], 1024  }
  0x6f   :  { %374 = vsyncadd [#allocation4], 4294966272 }
  0x70   :  { %375 = dma.done.wait [#allocation7], 128  }
  0x71   :  { %376 = vsyncadd [#allocation7], 4294967168 }
  0x72   :  { %264 = vsyncpa [#allocation3], 1 }
  0x73   :  { %265 = vsyncpa [#allocation4], 1 }
  0x74   :  { %266 = vsyncpa [#allocation7], 1 }

</bundles_post_ra>
